<compile_context>
chip_gen: v7x
topology: tpu7x:2x2x1
jax: 0.10.0
libtpu: 0.0.40
codegen_flags: <defaults>
</compile_context>

<pallas_src>
import functools

import jax
import jax.numpy as jnp
from jax.experimental import pallas as pl
from jax.experimental.pallas import tpu as pltpu


def _round_up(x, m):
    return (x + m - 1) // m * m


# ----------------------------- Pallas kernel ---------------------------------

def ebm_cfg_kernel(x_ref, tb_ref, txt_ref, sdiv_ref,
                   w1_ref, wc_ref, w2p_ref, b2p_ref,
                   out_ref, *, num_cond):
    """One (batch b, frame-tile f) grid step.

    x_ref   : (TF, D)    activation rows for this tile (matmul dtype)
    tb_ref  : (1, H)     per-batch timestep bias (= temb@Wt + b1), f32
    txt_ref : (NC, CD)   text embeddings for this batch (matmul dtype)
    sdiv_ref: (1, 1)     scale / num_cond for this batch, f32
    w1_ref  : (D, H)     W1 (matmul dtype)
    wc_ref  : (CD, H)    Wc (matmul dtype)
    w2p_ref : (H, DP)    W2 zero-padded to DP = round_up(D, 128) lanes
    b2p_ref : (1, DP)    b2 zero-padded
    out_ref : (TF, DP)   lane-dense f32 output
    """
    # Shared pre-activation for all conditions: one MXU pass, f32 accumulation.
    base = (jnp.dot(x_ref[...], w1_ref[...],
                    preferred_element_type=jnp.float32) + tb_ref[...])      # (TF, H)
    h_unc = jnp.tanh(base)                                                  # (TF, H)

    # All conditional biases for this batch in one small matmul; broadcast over frames
    # in-kernel (txt is NOT pre-expanded over frames in the wrapper).
    cbias = jnp.dot(txt_ref[...], wc_ref[...],
                    preferred_element_type=jnp.float32)                     # (NC, H)

    # EBM delta accumulation: loop only over NC (small, static); broadcast adds, no
    # per-batch slices / concats.
    hd = (-float(num_cond)) * h_unc
    for n in range(num_cond):
        hd = hd + jnp.tanh(base + cbias[n:n + 1, :])                        # (TF, H)

    # Single broadcasted VPU multiply with (scale / num_cond).
    h_mix = h_unc + sdiv_ref[...] * hd                                      # (TF, H) f32

    # Single W2 projection for the whole EBM combination (b2 cancelled in the deltas).
    out_ref[...] = (jnp.dot(h_mix.astype(w2p_ref.dtype), w2p_ref[...],
                            preferred_element_type=jnp.float32) + b2p_ref[...])


# ------------------------------- Glue / wrapper -------------------------------

def timestep_embedding(timesteps, dim):
    half = dim // 2
    freqs = jnp.exp(-jnp.log(10000.0) * jnp.arange(half, dtype=jnp.float32) / half)
    args = timesteps.astype(jnp.float32)[:, None] * freqs[None, :]
    return jnp.concatenate([jnp.cos(args), jnp.sin(args)], axis=-1)  # (bs, dim)


def make_params(key, D, H, TD, CD):
    ks = jax.random.split(key, 6)
    s = 0.1
    return {
        "w1": s * jax.random.normal(ks[0], (D, H), jnp.float32),
        "b1": s * jax.random.normal(ks[1], (1, H), jnp.float32),
        "wt": s * jax.random.normal(ks[2], (TD, H), jnp.float32),
        "wc": s * jax.random.normal(ks[3], (CD, H), jnp.float32),
        "w2": s * jax.random.normal(ks[4], (H, D), jnp.float32),
        "b2": s * jax.random.normal(ks[5], (1, D), jnp.float32),
    }


def _estimate_block_vmem_bytes(TF, D, DP, H, NC, CD, act_bytes):
    """Rough per-step VMEM footprint: double-buffered blocks + weights + temporaries."""
    dbuf = 2
    io = dbuf * TF * D * act_bytes + dbuf * TF * DP * 4
    small = dbuf * (H * 4 + NC * CD * act_bytes + 4)
    weights = dbuf * (D * H + CD * H + H * DP) * act_bytes + dbuf * DP * 4
    temps = 4 * TF * H * 4 + NC * H * 4
    return io + small + weights + temps


@functools.partial(jax.jit, static_argnames=("t_dim", "use_bf16"))
def ebm_sample_forward(x, timesteps, multi_text_embedding, scale, params,
                       t_dim=16, use_bf16=False):
    """Pallas implementation of EBMSampleModel.forward.

    x:                    [bs, njoints, nfeats, nframes]  float32
    timesteps:            [bs]                            int32
    multi_text_embedding: [num_cond, bs, text_dim]        float32
    scale:                [bs]                            float32
    returns:              [bs, njoints, nfeats, nframes]  float32
    """
    bs, nj, nf, F = x.shape
    D = nj * nf
    NC, _, CD = multi_text_embedding.shape
    H = params["w1"].shape[1]

    DP = _round_up(D, 128)                 # lane-dense output width (unmasked vst)
    TF = min(512, _round_up(F, 8))         # frame-tile rows per grid step, sublane-aligned
    Fp = _round_up(F, TF)                  # padded frame count (multiple of TF)

    mm_dtype = jnp.bfloat16 if use_bf16 else jnp.float32
    act_bytes = 2 if use_bf16 else 4

    # --- wrapper-side layout (cheap; no activation-sized concatenates) ---
    x3 = jnp.transpose(x, (0, 3, 1, 2)).reshape(bs, F, D)                  # (bs, F, D)
    if Fp != F:
        x3 = jnp.pad(x3, ((0, 0), (0, Fp - F), (0, 0)))
    x3 = x3.astype(mm_dtype)

    # Per-batch timestep bias folded with b1: tiny (bs,TD)@(TD,H) wrapper matmul.
    temb = timestep_embedding(timesteps, t_dim)                            # (bs, TD)
    tbias = (temb @ params["wt"] + params["b1"]).reshape(bs, 1, H).astype(jnp.float32)

    txt = jnp.transpose(multi_text_embedding, (1, 0, 2)).astype(mm_dtype)  # (bs, NC, CD)
    sdiv = (scale.astype(jnp.float32) / float(NC)).reshape(bs, 1, 1)       # (bs, 1, 1)

    w1 = params["w1"].astype(mm_dtype)
    wc = params["wc"].astype(mm_dtype)
    w2p = jnp.pad(params["w2"], ((0, 0), (0, DP - D))).astype(mm_dtype)    # (H, DP)
    b2p = jnp.pad(params["b2"], ((0, 0), (0, DP - D))).astype(jnp.float32)  # (1, DP)

    kernel = functools.partial(ebm_cfg_kernel, num_cond=NC)
    grid = (bs, Fp // TF)

    grid_spec = pltpu.PrefetchScalarGridSpec(
        num_scalar_prefetch=0,
        grid=grid,
        in_specs=[
            pl.BlockSpec((None, TF, D), lambda b, f: (b, f, 0)),     # x rows
            pl.BlockSpec((None, 1, H), lambda b, f: (b, 0, 0)),      # timestep bias
            pl.BlockSpec((None, NC, CD), lambda b, f: (b, 0, 0)),    # text embeddings
            pl.BlockSpec((None, 1, 1), lambda b, f: (b, 0, 0)),      # scale / num_cond
            pl.BlockSpec((D, H), lambda b, f: (0, 0)),               # W1 (resident)
            pl.BlockSpec((CD, H), lambda b, f: (0, 0)),              # Wc (resident)
            pl.BlockSpec((H, DP), lambda b, f: (0, 0)),              # W2 padded (resident)
            pl.BlockSpec((1, DP), lambda b, f: (0, 0)),              # b2 padded (resident)
        ],
        out_specs=pl.BlockSpec((None, TF, DP), lambda b, f: (b, f, 0)),
    )

    est = _estimate_block_vmem_bytes(TF, D, DP, H, NC, CD, act_bytes)
    vmem_limit = None
    if est > 24 * 1024 * 1024:
        vmem_limit = min(int(1.5 * est), 100 * 1024 * 1024)

    out_p = pl.pallas_call(
        kernel,
        out_shape=jax.ShapeDtypeStruct((bs, Fp, DP), jnp.float32),
        grid_spec=grid_spec,
        compiler_params=pltpu.CompilerParams(
            dimension_semantics=("parallel", "parallel"),
            vmem_limit_bytes=vmem_limit),
    )(x3, tbias, txt, sdiv, w1, wc, w2p, b2p)

    # Drop lane/row padding and return PyTorch layout [bs, njoints, nfeats, nframes].
    out = out_p[:, :F, :D].reshape(bs, F, nj, nf)
    return jnp.transpose(out, (0, 2, 3, 1))


# ------------------------------ pure-JAX reference ----------------------------

def _inner_model_ref(x_k, temb2d, txt_b_or_none, params):
    base = (jnp.einsum("bfd,dh->bfh", x_k, params["w1"])
            + params["b1"][None]
            + (temb2d @ params["wt"])[:, None, :])
    if txt_b_or_none is not None:
        base = base + (txt_b_or_none @ params["wc"])[:, None, :]
    return jnp.tanh(base) @ params["w2"] + params["b2"][None]


def ebm_sample_reference(x, timesteps, multi_text_embedding, scale, params, t_dim=16):
    bs, nj, nf, F = x.shape
    D = nj * nf
    NC = multi_text_embedding.shape[0]
    x_k = jnp.transpose(x, (0, 3, 1, 2)).reshape(bs, F, D)
    temb = timestep_embedding(timesteps, t_dim)
    out_unc = _inner_model_ref(x_k, temb, None, params)
    ebm = out_unc
    for i in range(NC):
        out_i = _inner_model_ref(x_k, temb, multi_text_embedding[i], params)
        ebm = ebm + scale.reshape(-1, 1, 1) * (out_i - out_unc) / NC
    return jnp.transpose(ebm.reshape(bs, F, nj, nf), (0, 2, 3, 1))


# ----------------------------------- main -------------------------------------

if __name__ == "__main__":
    bs, njoints, nfeats, nframes = 2, 4, 4, 16
    num_cond, text_dim, hidden, t_dim = 2, 32, 32, 16

    key = jax.random.PRNGKey(0)
    kx, kt, ktxt, ksc, kp = jax.random.split(key, 5)

    x = jax.random.normal(kx, (bs, njoints, nfeats, nframes), jnp.float32)
    timesteps = jax.random.randint(kt, (bs,), 0, 1000, jnp.int32)
    multi_text_embedding = jax.random.normal(
        ktxt, (num_cond, bs, text_dim), jnp.float32)
    scale = 2.5 * jnp.ones((bs,), jnp.float32)

    params = make_params(kp, njoints * nfeats, hidden, t_dim, text_dim)

    ref = ebm_sample_reference(x, timesteps, multi_text_embedding, scale, params,
                               t_dim=t_dim)

    # f32 matmul path (tight check; only fp32 reassociation differs from the reference).
    out = ebm_sample_forward(x, timesteps, multi_text_embedding, scale, params,
                             t_dim=t_dim, use_bf16=False)
    out = jax.block_until_ready(out)
    assert out.shape == (bs, njoints, nfeats, nframes)
    assert jnp.allclose(out, ref, rtol=1e-4, atol=1e-4), "f32 mismatch vs reference"

    # bf16 matmul operands (f32 accumulation, f32 element-wise path) — loose tolerance.
    out_bf16 = ebm_sample_forward(x, timesteps, multi_text_embedding, scale, params,
                                  t_dim=t_dim, use_bf16=True)
    out_bf16 = jax.block_until_ready(out_bf16)
    assert jnp.allclose(out_bf16, ref, rtol=5e-2, atol=5e-2), "bf16 mismatch vs reference"

    print("KERNEL_OK")
</pallas_src>

<mosaic_0001>
module attributes {stable_mosaic.version = 11 : i64} {
  func.func @ebm_cfg_kernel(%arg0: i32, %arg1: i32, %arg2: memref<1x16x16xf32, #tpu.memory_space<vmem>>, %arg3: memref<1x1x32xf32, #tpu.memory_space<vmem>>, %arg4: memref<1x2x32xf32, #tpu.memory_space<vmem>>, %arg5: memref<1x1x1xf32, #tpu.memory_space<vmem>>, %arg6: memref<16x32xf32, #tpu.memory_space<vmem>>, %arg7: memref<32x32xf32, #tpu.memory_space<vmem>>, %arg8: memref<32x128xf32, #tpu.memory_space<vmem>>, %arg9: memref<1x128xf32, #tpu.memory_space<vmem>>, %arg10: memref<1x16x128xf32, #tpu.memory_space<vmem>>) attributes {dimension_semantics = [#tpu.dimension_semantics<parallel>, #tpu.dimension_semantics<parallel>], iteration_bounds = array<i64: 2, 1>, scalar_prefetch = 0 : i64, scratch_operands = 0 : i64, tpu.core_type = #tpu.core_type<tc>, window_params = [{transform_indices = @transform_0, window_bounds = array<i64: 1, 16, 16>}, {transform_indices = @transform_1, window_bounds = array<i64: 1, 1, 32>}, {transform_indices = @transform_2, window_bounds = array<i64: 1, 2, 32>}, {transform_indices = @transform_3, window_bounds = array<i64: 1, 1, 1>}, {pipeline_mode = #tpu.pipeline_mode<synchronous>, transform_indices = @transform_4, window_bounds = array<i64: 16, 32>}, {pipeline_mode = #tpu.pipeline_mode<synchronous>, transform_indices = @transform_5, window_bounds = array<i64: 32, 32>}, {pipeline_mode = #tpu.pipeline_mode<synchronous>, transform_indices = @transform_6, window_bounds = array<i64: 32, 128>}, {pipeline_mode = #tpu.pipeline_mode<synchronous>, transform_indices = @transform_7, window_bounds = array<i64: 1, 128>}, {transform_indices = @transform_8, window_bounds = array<i64: 1, 16, 128>}]} {
    %c0 = arith.constant 0 : index
    %c0_0 = arith.constant 0 : index
    %c0_1 = arith.constant 0 : index
    %0 = vector.load %arg2[%c0, %c0_0, %c0_1] : memref<1x16x16xf32, #tpu.memory_space<vmem>>, vector<1x16x16xf32>
    %1 = vector.shape_cast %0 : vector<1x16x16xf32> to vector<16x16xf32>
    %c0_2 = arith.constant 0 : index
    %c0_3 = arith.constant 0 : index
    %2 = vector.load %arg6[%c0_2, %c0_3] : memref<16x32xf32, #tpu.memory_space<vmem>>, vector<16x32xf32>
    %cst = arith.constant dense<0.000000e+00> : vector<16x32xf32>
    %3 = tpu.matmul %1, %2, %cst {dimension_numbers = #tpu.dot_dimension_numbers<[1], [0], [0], [1], [0, 0, 1, 1], [], []>} : vector<16x16xf32>, vector<16x32xf32>, vector<16x32xf32> -> vector<16x32xf32>
    %c0_4 = arith.constant 0 : index
    %c0_5 = arith.constant 0 : index
    %c0_6 = arith.constant 0 : index
    %4 = vector.load %arg3[%c0_4, %c0_5, %c0_6] : memref<1x1x32xf32, #tpu.memory_space<vmem>>, vector<1x1x32xf32>
    %5 = vector.shape_cast %4 : vector<1x1x32xf32> to vector<1x32xf32>
    %6 = vector.broadcast %5 : vector<1x32xf32> to vector<16x32xf32>
    %7 = arith.addf %3, %6 : vector<16x32xf32>
    %8 = math.tanh %7 : vector<16x32xf32>
    %c0_7 = arith.constant 0 : index
    %c0_8 = arith.constant 0 : index
    %c0_9 = arith.constant 0 : index
    %9 = vector.load %arg4[%c0_7, %c0_8, %c0_9] : memref<1x2x32xf32, #tpu.memory_space<vmem>>, vector<1x2x32xf32>
    %10 = vector.shape_cast %9 : vector<1x2x32xf32> to vector<2x32xf32>
    %c0_10 = arith.constant 0 : index
    %c0_11 = arith.constant 0 : index
    %11 = vector.load %arg7[%c0_10, %c0_11] : memref<32x32xf32, #tpu.memory_space<vmem>>, vector<32x32xf32>
    %cst_12 = arith.constant dense<0.000000e+00> : vector<2x32xf32>
    %12 = tpu.matmul %10, %11, %cst_12 {dimension_numbers = #tpu.dot_dimension_numbers<[1], [0], [0], [1], [0, 0, 1, 1], [], []>} : vector<2x32xf32>, vector<32x32xf32>, vector<2x32xf32> -> vector<2x32xf32>
    %cst_13 = arith.constant -2.000000e+00 : f32
    %13 = vector.broadcast %cst_13 : f32 to vector<16x32xf32>
    %14 = arith.mulf %13, %8 : vector<16x32xf32>
    %15 = vector.extract_strided_slice %12 {offsets = [0, 0], sizes = [1, 32], strides = [1, 1]} : vector<2x32xf32> to vector<1x32xf32>
    %16 = vector.broadcast %15 : vector<1x32xf32> to vector<16x32xf32>
    %17 = arith.addf %7, %16 : vector<16x32xf32>
    %18 = math.tanh %17 : vector<16x32xf32>
    %19 = arith.addf %14, %18 : vector<16x32xf32>
    %20 = vector.extract_strided_slice %12 {offsets = [1, 0], sizes = [1, 32], strides = [1, 1]} : vector<2x32xf32> to vector<1x32xf32>
    %21 = vector.broadcast %20 : vector<1x32xf32> to vector<16x32xf32>
    %22 = arith.addf %7, %21 : vector<16x32xf32>
    %23 = math.tanh %22 : vector<16x32xf32>
    %24 = arith.addf %19, %23 : vector<16x32xf32>
    %c0_14 = arith.constant 0 : index
    %c0_15 = arith.constant 0 : index
    %c0_16 = arith.constant 0 : index
    %25 = vector.load %arg5[%c0_14, %c0_15, %c0_16] : memref<1x1x1xf32, #tpu.memory_space<vmem>>, vector<1x1x1xf32>
    %26 = vector.shape_cast %25 : vector<1x1x1xf32> to vector<1x1xf32>
    %27 = vector.broadcast %26 : vector<1x1xf32> to vector<16x32xf32>
    %28 = arith.mulf %27, %24 : vector<16x32xf32>
    %29 = arith.addf %8, %28 : vector<16x32xf32>
    %c0_17 = arith.constant 0 : index
    %c0_18 = arith.constant 0 : index
    %30 = vector.load %arg8[%c0_17, %c0_18] : memref<32x128xf32, #tpu.memory_space<vmem>>, vector<32x128xf32>
    %cst_19 = arith.constant dense<0.000000e+00> : vector<16x128xf32>
    %31 = tpu.matmul %29, %30, %cst_19 {dimension_numbers = #tpu.dot_dimension_numbers<[1], [0], [0], [1], [0, 0, 1, 1], [], []>} : vector<16x32xf32>, vector<32x128xf32>, vector<16x128xf32> -> vector<16x128xf32>
    %c0_20 = arith.constant 0 : index
    %c0_21 = arith.constant 0 : index
    %32 = vector.load %arg9[%c0_20, %c0_21] : memref<1x128xf32, #tpu.memory_space<vmem>>, vector<1x128xf32>
    %33 = vector.broadcast %32 : vector<1x128xf32> to vector<16x128xf32>
    %34 = arith.addf %31, %33 : vector<16x128xf32>
    %c0_22 = arith.constant 0 : index
    %c0_23 = arith.constant 0 : index
    %c0_24 = arith.constant 0 : index
    %35 = vector.load %arg10[%c0_22, %c0_23, %c0_24] : memref<1x16x128xf32, #tpu.memory_space<vmem>>, vector<1x16x128xf32>
    %36 = vector.shape_cast %35 : vector<1x16x128xf32> to vector<16x128xf32>
    %37 = vector.shape_cast %34 : vector<16x128xf32> to vector<1x16x128xf32>
    tpu.vector_store %arg10[%c0_22, %c0_23, %c0_24], %37 {strides = array<i32>} : memref<1x16x128xf32, #tpu.memory_space<vmem>>, vector<1x16x128xf32>,
    return
  }
  func.func @transform_0(%arg0: i32, %arg1: i32) -> (i32, i32, i32) {
    %c0_i32 = arith.constant 0 : i32
    %c0_i32_0 = arith.constant 0 : i32
    return %arg0, %arg1, %c0_i32 : i32, i32, i32
  }
  func.func @transform_1(%arg0: i32, %arg1: i32) -> (i32, i32, i32) {
    %c0_i32 = arith.constant 0 : i32
    %c0_i32_0 = arith.constant 0 : i32
    %c0_i32_1 = arith.constant 0 : i32
    return %arg0, %c0_i32, %c0_i32_0 : i32, i32, i32
  }
  func.func @transform_2(%arg0: i32, %arg1: i32) -> (i32, i32, i32) {
    %c0_i32 = arith.constant 0 : i32
    %c0_i32_0 = arith.constant 0 : i32
    %c0_i32_1 = arith.constant 0 : i32
    return %arg0, %c0_i32, %c0_i32_0 : i32, i32, i32
  }
  func.func @transform_3(%arg0: i32, %arg1: i32) -> (i32, i32, i32) {
    %c0_i32 = arith.constant 0 : i32
    %c0_i32_0 = arith.constant 0 : i32
    %c0_i32_1 = arith.constant 0 : i32
    return %arg0, %c0_i32, %c0_i32_0 : i32, i32, i32
  }
  func.func @transform_4(%arg0: i32, %arg1: i32) -> (i32, i32) {
    %c0_i32 = arith.constant 0 : i32
    %c0_i32_0 = arith.constant 0 : i32
    %c0_i32_1 = arith.constant 0 : i32
    return %c0_i32, %c0_i32_0 : i32, i32
  }
  func.func @transform_5(%arg0: i32, %arg1: i32) -> (i32, i32) {
    %c0_i32 = arith.constant 0 : i32
    %c0_i32_0 = arith.constant 0 : i32
    %c0_i32_1 = arith.constant 0 : i32
    return %c0_i32, %c0_i32_0 : i32, i32
  }
  func.func @transform_6(%arg0: i32, %arg1: i32) -> (i32, i32) {
    %c0_i32 = arith.constant 0 : i32
    %c0_i32_0 = arith.constant 0 : i32
    %c0_i32_1 = arith.constant 0 : i32
    return %c0_i32, %c0_i32_0 : i32, i32
  }
  func.func @transform_7(%arg0: i32, %arg1: i32) -> (i32, i32) {
    %c0_i32 = arith.constant 0 : i32
    %c0_i32_0 = arith.constant 0 : i32
    %c0_i32_1 = arith.constant 0 : i32
    return %c0_i32, %c0_i32_0 : i32, i32
  }
  func.func @transform_8(%arg0: i32, %arg1: i32) -> (i32, i32, i32) {
    %c0_i32 = arith.constant 0 : i32
    %c0_i32_0 = arith.constant 0 : i32
    return %arg0, %arg1, %c0_i32 : i32, i32, i32
  }
}

</mosaic_0001>

<bundles_post_ra>
// kernel: ebm_sample_forward.1
= control target key start
LH: loop header
LB: loop body
LE: loop exit
PB: predicated region body
PF: predicated region fallthrough
CT: control target
= control target key end

     0   :  { %s1009_s27 = smov 0   ;;  %s1011_s28 = smov 0   ;;  %s1097_s0 = inlined_call_operand.vmem [shape: f32[2,16,16], index: 0, kind: input, shape index: {}]   ;;  %s1098_s1 = inlined_call_operand.vmem [shape: f32[2,1,32], index: 1, kind: input, shape index: {}]   ;;  %s1099_s2 = inlined_call_operand.vmem [shape: f32[2,2,32], index: 2, kind: input, shape index: {}]   ;;  %s1100_s3 = inlined_call_operand.vmem [shape: f32[2,1,1], index: 3, kind: input, shape index: {}]   ;;  %s1101_s4 = inlined_call_operand.vmem [shape: f32[16,32], index: 4, kind: input, shape index: {}]   ;;  %s1102_s5 = inlined_call_operand.vmem [shape: f32[32,32], index: 5, kind: input, shape index: {}]   ;;  %s1103_s6 = inlined_call_operand.vmem [shape: f32[32,128], index: 6, kind: input, shape index: {}]   ;;  %s1104_s7 = inlined_call_operand.vmem [shape: f32[1,128], index: 7, kind: input, shape index: {}]   ;;  %s1105_s8 = inlined_call_operand.vmem [shape: f32[2,16,128], index: 8, kind: output, shape index: {}]  }
   0x1   :  { %s1013_s29 = smov 0  }
   0x2 LB: > { %s30_s30 = sadd.s32 1, %s954_s28  ;;  %p815_p0 = scmp.ge.s32.totalorder %s958_s29, 1  ;;  %s958_s29 = sphi %s1013_s29, %s18_s29   ;;  %s954_s28 = sphi %s1011_s28, %s1107_s28   ;;  %s950_s27 = sphi %s1009_s27, %s1106_s27  }
   0x3   : > { %p32_p1 = scmp.ge.s32.totalorder %s30_s30, 2  ;;  %p308_p2 = scmp.lt.s32.totalorder %s958_s29, 3 }
   0x5   : > { %s1109_s30 = smov (%p32_p1, %s30_s30), 0  ;;  %p309_p3 = pnand %p815_p0, %p308_p2 }
   0x6   : > { %v486_v0 = vld [vmem:[%s1102_s5] sm:$0xff] (!%p309_p3)  ;;  %v487_v1 = vld [vmem:[%s1102_s5 + $0x8] sm:$0xff] (!%p309_p3)  ;;  %p361_p4 = scmp.lt.s32.totalorder (!%p309_p3), %s950_s27, 1  ;;  %v960_v3 = vmov (!%p309_p3), 0.0|0.0   ;;  %v488_v6 = vld [vmem:[%s1102_s5 + $0x10] sm:$0xff] (!%p309_p3)  ;;  %vm961_vm0 = vmmov (!%p309_p3), 0   ;;  %v566_v22 = vlaneseq (!%p309_p3) }
   0x7   : > { %312 = sbr.rel (%p309_p3) target bundleno = 472 (0x1d8), region = 52  ;;  %v392_v2 = vld [vmem:[%s1101_s4] sm:$0xff] (!%p309_p3)  ;;  %881 = vmatprep.subr.bf16.mxu1 (!%p309_p3), %v960_v3  ;;  %v882_v4 = vpack.c.bf16 (!%p309_p3), %v487_v1, %v486_v0  ;;  %v393_v5 = vld [vmem:[%s1101_s4 + $0x8] sm:$0xff] (!%p309_p3)  ;;  %v489_v7 = vld [vmem:[%s1102_s5 + $0x18] sm:$0xff] (!%p309_p3)  ;;  %v962_v9 = vmov (!%p309_p3), 0.0   ;;  %v963_v11 = vmov (!%p309_p3), 0  }
   0x8   : > { %v877_v8 = vpack.c.bf16 (!%p309_p3), %v393_v5, %v392_v2  ;;  %863 = vmatprep.mubr.msk.f32.mxu1 (!%p309_p3), %vm961_vm0, %v962_v9  ;;  %v885_v10 = vpack.c.bf16 (!%p309_p3), %v489_v7, %v488_v6  ;;  %923 = vset.pattern.permute.xlu0 (!%p309_p3), %v963_v11  ;;  %vm401_vm1 = vcmask (!%p309_p3), 130048   ;;  %vm490_vm2 = vcmask (!%p309_p3), 261120   ;;  %v600_v16 = vld [vmem:[%s1103_s6] sm:$0xff] (!%p309_p3)  ;;  %v601_v17 = vld [vmem:[%s1103_s6 + $0x8] sm:$0xff] (!%p309_p3)  ;;  %v602_v19 = vld [vmem:[%s1103_s6 + $0x10] sm:$0xff] (!%p309_p3) }
   0x9   : > { %883 = vmatpush3.bf16.msra.mxu1 (!%p309_p3), %v882_v4  ;;  %v887_v18 = vpack.c.bf16 (!%p309_p3), %v601_v17, %v600_v16  ;;  %v603_v20 = vld [vmem:[%s1103_s6 + $0x18] sm:$0xff] (!%p309_p3)  ;;  %v567_v23 = vshrl.u32 (!%p309_p3), %v566_v22, 7  ;;  %v826_v56 = vld [vmem:[%s1104_s7] ss:$0 sm:$0xff] (!%p309_p3) }
   0xa   : > { %878 = vmatprep.subr.bf16.mxu0 (!%p309_p3), %v877_v8  ;;  %884 = vmatprep.subr.bf16.mxu1 (!%p309_p3), %v960_v3  ;;  %v891_v21 = vpack.c.bf16 (!%p309_p3), %v603_v20, %v602_v19 }
   0xb   : > { %880 = vmatpush3.bf16.msra.mxu0 (!%p309_p3), %v877_v8  ;;  %v568_v25 = vsub.s32 (!%p309_p3), 0, %v567_v23  ;;  %v578_v26 = vsub.s32 (!%p309_p3), 1, %v567_v23 }
   0xc   : > { %888 = vmatprep.subr.bf16.mxu0 (!%p309_p3), %v887_v18 }
   0xd   : > { %886 = vmatpush3.bf16.msra.mxu1 (!%p309_p3), %v885_v10 }
   0xe   : > { %s1111_s27 = smov (!%p361_p4, %s950_s27), 1 }
   0xf   : > { %s831_s21 = sshll.u32 %s1111_s27, 4  ;;  %s818_s22 = sshll.u32 %s1111_s27, 1 }
  0x10   : > { %s368_s25 = scalar_lea.vmem %s1097_s0, %s831_s21  ;;  %s376_s10 = scalar_lea.vmem %s1099_s2, %s818_s22 }
  0x11   : > { %v390_v12 = vld [vmem:[%s368_s25] sm:$0xff]  ;;  %v391_v13 = vld [vmem:[%s368_s25 + $0x8] sm:$0xff]  ;;  %s379_s13 = scalar_lea.vmem %s1100_s3, %s1111_s27  ;;  %s372_s25 = scalar_lea.vmem %s1098_s1, %s1111_s27 }
  0x12   : > { %852 = vmatprep.mubr.msk.f32.mxu0 %vm401_vm1, %v390_v12  ;;  %v485_v14 = vld [vmem:[%s376_s10] sm:$0x3]  ;;  %s388_s12 = scalar_lea.vmem %s1105_s8, %s831_s21 }
  0x13   : > { %v825_v15 = vld [vmem:[%s379_s13] ss:$0 sm:$0xff]  ;;  %853 = vmatmul.mubr.msk.f32.vlgmr.msra.gmra.mrb[0].mxu0 %vm401_vm1, %v391_v13  ;;  %864 = vmatmul.mubr.msk.f32.vlgmr.msra.gmra.mrb[0].mxu1 %vm490_vm2, %v485_v14 }
  0x14   : > { %593 = vperm.xlu0 %923, %v825_v15   ;;  %890 = vmatpush3.bf16.msra.mxu0 %v887_v18  ;;  %v821_v24 = vld [vmem:[%s372_s25] ss:$0 sm:$0xff] }
  0x15   : > { %892 = vmatprep.subr.bf16.mxu0 %v891_v21 }
  0x18   : > { %894 = vmatpush3.bf16.msra.mxu0 %v891_v21 }
  0x93   : > { %v594_v47 = vpop.permute.xlu0 %593 }
  0xe6   : > { %v854_v27 = vpop.f32.mrb[0].mxu0  ;;  %v560_v31 = vpop.f32.mrb[0].mxu1 }
  0xe7   : > { %v480_v28 = vadd.f32 %v854_v27, %v821_v24  ;;  %v474_v29 = vpop.f32.mrb[1].mxu0  ;;  %v569_v32 = vrot.slane %v560_v31, %v568_v25  ;;  %v579_v33 = vrot.slane %v560_v31, %v578_v26  ;;  %v865_v34 = vpop.f32.mrb[1].mxu1 }
  0xe8   : > { %v475_v30 = vadd.f32 %v821_v24, %v474_v29 }
  0xe9   : > { %924 = vtanh.f32 %v480_v28  ;;  %v571_v36 = vadd.f32 %v569_v32, %v480_v28  ;;  %v581_v38 = vadd.f32 %v579_v33, %v480_v28 }
  0xea   : > { %926 = vtanh.f32 %v475_v30  ;;  %v570_v35 = vadd.f32 %v569_v32, %v475_v30  ;;  %v580_v37 = vadd.f32 %v579_v33, %v475_v30 }
  0xec   : > { %928 = vtanh.f32 %v570_v35 }
  0xed   : > { %930 = vtanh.f32 %v571_v36 }
  0xee   : > { %932 = vtanh.f32 %v580_v37 }
  0xef   : > { %934 = vtanh.f32 %v581_v38 }
  0xf3   : > { %v925_v39 = vpop.eup %924 }
  0xf4   : > { %v927_v40 = vpop.eup %926  ;;  %v565_v42 = vmul.f32 -2.0, %v925_v39 }
  0xf5   : > { %v564_v41 = vmul.f32 -2.0, %v927_v40 }
  0xf6   : > { %v929_v43 = vpop.eup %928 }
  0xf7   : > { %v931_v44 = vpop.eup %930  ;;  %v574_v45 = vadd.f32 %v929_v43, %v564_v41 }
  0xf8   : > { %v933_v46 = vpop.eup %932  ;;  %v575_v48 = vadd.f32 %v931_v44, %v565_v42 }
  0xf9   : > { %v935_v49 = vpop.eup %934  ;;  %v584_v50 = vadd.f32 %v933_v46, %v574_v45 }
  0xfa   : > { %v585_v51 = vadd.f32 %v935_v49, %v575_v48 }
  0xfb   : > { %v596_v52 = vmul.f32 %v594_v47, %v584_v50 }
  0xfc   : > { %v597_v53 = vmul.f32 %v594_v47, %v585_v51 }
  0xfd   : > { %v598_v54 = vadd.f32 %v927_v40, %v596_v52 }
  0xfe   : > { %v599_v55 = vadd.f32 %v925_v39, %v597_v53 }
  0xff   : > { %874 = vmatprep.mubr.msk.f32.mxu0 %vm490_vm2, %v598_v54 }
 0x100   : > { %875 = vmatmul.mubr.msk.f32.vlgmr.msra.gmra.mrb[2].mxu0 %vm490_vm2, %v599_v55 }
 0x1d3   : > { %v876_v57 = vpop.f32.mrb[2].mxu0 }
 0x1d4   : > { %v689_v58 = vadd.f32 %v876_v57, %v826_v56  ;;  %v683_v59 = vpop.f32.mrb[3].mxu0 }
 0x1d5   : > { %v684_v60 = vadd.f32 %v826_v56, %v683_v59 }
 0x1d6   : > { %693 = vst [vmem:[%s388_s12 + $0x8] sm:$0xff] %v689_v58 }
 0x1d7   : > { %692 = vst [vmem:[%s388_s12] sm:$0xff] %v684_v60 }
 0x1d8 PF: > { %s18_s29 = sadd.s32 1, %s958_s29   ;;  %s1106_s27 = smov %s954_s28 }
 0x1d9   : > { %p15_p5 = scmp.ge.s32.totalorder %s18_s29, 4   ;;  %s1107_s28 = smov %s1109_s30 }
 0x1db   :  { %17 = sbr.rel (!%p15_p5) target bundleno = 2 (0x2), region = 91 }

</bundles_post_ra>
